<compile_context>
chip_gen: v5e
topology: v5e:2x2
jax: 0.10.0
libtpu: 0.0.40
codegen_flags: <defaults>
</compile_context>

<pallas_src>
import jax
import jax.numpy as jnp
from jax import lax
from jax.experimental import pallas as pl
from jax.experimental.pallas import tpu as pltpu

_VMEM_LIMIT = 32 * 1024 * 1024   # raises v5e's 16 MiB scoped default; safe on v6e/v7x


# ----------------------------------------------------------------------------
# Parameter initialization (deterministic, synthetic).
# Linear weights are stored transposed vs PyTorch: (in_features, out_features).
# ----------------------------------------------------------------------------
def init_params(key, embed_size, hidden_size, num_layers, user_size,
                article_size, article_pad_idx, embedding_dim):
    keys = jax.random.split(key, 64)
    it = iter(keys)

    def u(shape, scale=0.2):
        return jax.random.uniform(next(it), shape, jnp.float32, -scale, scale)

    p = {}
    p["embed_user"] = u((user_size, embedding_dim), 0.5)
    ea = u((article_size, embedding_dim), 0.5)
    p["embed_article"] = ea.at[article_pad_idx].set(0.0)   # padding_idx row = 0

    # Bidirectional multi-layer LSTM: hidden per direction = hidden_size // 2.
    h2 = hidden_size // 2
    lstm = []
    in_dim = embed_size
    for _ in range(num_layers):
        layer = {}
        for d in ("fwd", "bwd"):
            wih = u((4 * h2, in_dim))
            whh = u((4 * h2, h2))
            b = u((4 * h2,))          # b_ih + b_hh folded together
            layer[d] = (wih, whh, b)
        lstm.append(layer)
        in_dim = hidden_size
    p["lstm"] = lstm

    # attn: Linear(H, H) + Tanh + Linear(H, 1, bias=False)
    p["attn_w1"] = u((hidden_size, hidden_size))
    p["attn_b1"] = u((hidden_size,))
    p["attn_w2"] = u((hidden_size, 1))

    # embed_mlp: Linear(emb_dim, 128) + ReLU + Linear(128, 64) + ReLU
    p["we1"] = u((embedding_dim, 128)); p["be1"] = u((128,))
    p["we2"] = u((128, 64));            p["be2"] = u((64,))

    # rnn_mlp: Linear(hidden_size, 64)
    p["wr"] = u((hidden_size, 64)); p["br"] = u((64,))

    # last_mlp: 128 -> 256 -> 128 -> 64 -> 1 (ReLU between, Sigmoid at end)
    p["l1w"] = u((128, 256)); p["l1b"] = u((256,))
    p["l2w"] = u((256, 128)); p["l2b"] = u((128,))
    p["l3w"] = u((128, 64));  p["l3b"] = u((64,))
    p["l4w"] = u((64, 1));    p["l4b"] = u((1,))
    return p


# ----------------------------------------------------------------------------
# Bidirectional LSTM (plain JAX).  Packed-sequence semantics:
#   * reverse direction starts at each sequence's true last step,
#   * outputs past seq_len are zero in BOTH directions (pad_packed_sequence).
# The fwd and time-reversed bwd directions of each layer run in ONE lax.scan
# (direction stacked as a leading axis) and the input projection x @ W_ih^T is
# hoisted out of the serial scan into one big MXU matmul per direction.
# TODO(synk): VMEM-resident Pallas scan kernel for the recurrence.
# ----------------------------------------------------------------------------
def _bilstm_layer(x, seq_lens, layer):
    B, S, _ = x.shape
    wih_f, whh_f, b_f = layer["fwd"]
    wih_b, whh_b, b_b = layer["bwd"]
    H = whh_f.shape[1]

    gx_f = jnp.einsum("bsd,gd->sbg", x, wih_f) + b_f       # (S, B, 4H)
    gx_b = jnp.einsum("bsd,gd->sbg", x, wih_b) + b_b       # (S, B, 4H)
    valid = jnp.arange(S)[:, None] < seq_lens[None, :]     # (S, B)

    # Direction axis d: 0 = fwd (time order), 1 = bwd (time-reversed).
    gx = jnp.stack([gx_f, gx_b[::-1]], axis=1)             # (S, 2, B, 4H)
    vm = jnp.stack([valid, valid[::-1]], axis=1)           # (S, 2, B)
    whh = jnp.stack([whh_f, whh_b], axis=0)                # (2, 4H, H)

    def step(carry, inp):
        h, c = carry                                       # (2, B, H) each
        gx_t, v_t = inp
        gates = gx_t + jnp.einsum("dbh,dgh->dbg", h, whh)
        i, f, g, o = jnp.split(gates, 4, axis=-1)
        i = jax.nn.sigmoid(i)
        f = jax.nn.sigmoid(f)
        g = jnp.tanh(g)
        o = jax.nn.sigmoid(o)
        c_new = f * c + i * g
        h_new = o * jnp.tanh(c_new)
        v = v_t[..., None]
        # Hold state on padded steps: gives the reverse direction its "start at
        # true last step" semantics; harmless for fwd (padded outputs zeroed).
        h_next = jnp.where(v, h_new, h)
        c_next = jnp.where(v, c_new, c)
        out = jnp.where(v, h_new, 0.0)                     # pad_packed zeros
        return (h_next, c_next), out

    init = (jnp.zeros((2, B, H), jnp.float32), jnp.zeros((2, B, H), jnp.float32))
    _, outs = lax.scan(step, init, (gx, vm))               # (S, 2, B, H)
    out_f = jnp.transpose(outs[:, 0], (1, 0, 2))           # (B, S, H)
    out_b = jnp.transpose(outs[:, 1][::-1], (1, 0, 2))     # (B, S, H)
    return jnp.concatenate([out_f, out_b], axis=-1)        # (B, S, 2H)


def bilstm(x, seq_lens, lstm_params):
    inp = x
    for layer in lstm_params:
        inp = _bilstm_layer(inp, seq_lens, layer)
    return inp                                             # (B, S, hidden)


# ----------------------------------------------------------------------------
# Pallas kernel 1: batched causal attention over LSTM outputs.
# Each grid step handles a (Bb, S, H) block; the causal softmax-average uses a
# tiny (S, S) tril applied as a batched bf16 matmul (no (R, R) mask).
# ----------------------------------------------------------------------------
def attn_kernel(h_ref, vmask_ref, tril_ref, wa_ref, ba_ref, va_ref, out_ref):
    f32, bf16 = jnp.float32, jnp.bfloat16
    Bb, S, H = h_ref.shape

    h = h_ref[...]                                         # (Bb, S, H) f32
    vm = vmask_ref[...]                                    # (Bb, S, 1) 1/0 valid

    hf = h.reshape(Bb * S, H)
    u = jnp.tanh(jnp.dot(hf.astype(bf16), wa_ref[...],
                         preferred_element_type=f32) + ba_ref[...])
    s = jnp.dot(u.astype(bf16), va_ref[...],
                preferred_element_type=f32).reshape(Bb, S, 1)

    # Mask padded positions BEFORE the max; exp() of the masked scores so an
    # all-padding batch yields exactly 0 (no inf*0 NaN).  Per-batch max.
    s = jnp.where(vm > 0.5, s, -1e30)
    m = jnp.max(s, axis=1, keepdims=True)                  # (Bb, 1, 1)
    e = jnp.exp(s - m) * vm                                # (Bb, S, 1)

    tril = jnp.broadcast_to(tril_ref[...], (Bb, S, S))     # bf16 causal mask
    eh = (e * h).astype(bf16)
    num = lax.dot_general(tril, eh, (((2,), (1,)), ((0,), (0,))),
                          preferred_element_type=f32)      # (Bb, S, H)
    den = lax.dot_general(tril, e.astype(bf16), (((2,), (1,)), ((0,), (0,))),
                          preferred_element_type=f32)      # (Bb, S, 1)
    ctx = num * pl.reciprocal(jnp.maximum(den, 1e-30), approx=True)

    out_ref[...] = (ctx * vm).astype(out_ref.dtype)        # zero padded rows


def _pick_bb(B, S, max_rows=512):
    """Largest divisor of B with Bb*S <= max_rows, preferring an even grid
    (>= 2 steps) so both v7x TensorCores get work.  Fallback is 1 (safe)."""
    cands = [d for d in range(1, B + 1) if B % d == 0 and d * S <= max_rows]
    if not cands:
        return 1
    even = [d for d in cands if (B // d) % 2 == 0]
    pool = even if even else cands
    return max(pool)


def attention_context(h_all, seq_lens, wa, ba, va):
    B, S, H = h_all.shape
    Bb = _pick_bb(B, S)
    grid = (B // Bb,)
    bf16 = jnp.bfloat16

    vmask = (jnp.arange(S)[None, :] < seq_lens[:, None]).astype(jnp.float32)
    vmask = vmask[:, :, None]                              # (B, S, 1)
    tril = jnp.tril(jnp.ones((S, S), jnp.float32)).astype(bf16)   # (S, S)

    in_specs = [
        pl.BlockSpec((Bb, S, H), lambda i: (i, 0, 0)),     # h (f32)
        pl.BlockSpec((Bb, S, 1), lambda i: (i, 0, 0)),     # valid mask
        pl.BlockSpec((S, S), lambda i: (0, 0)),            # tril (bf16)
        pl.BlockSpec((H, H), lambda i: (0, 0)),            # attn W1 (bf16)
        pl.BlockSpec((1, H), lambda i: (0, 0)),            # attn b1 (f32)
        pl.BlockSpec((H, 1), lambda i: (0, 0)),            # attn W2 (bf16)
    ]
    out_spec = pl.BlockSpec((Bb, S, H), lambda i: (i, 0, 0))

    return pl.pallas_call(
        attn_kernel,
        out_shape=jax.ShapeDtypeStruct((B, S, H), jnp.float32),
        grid=grid,
        in_specs=in_specs,
        out_specs=out_spec,
        compiler_params=pltpu.CompilerParams(
            dimension_semantics=("parallel",),
            vmem_limit_bytes=_VMEM_LIMIT),
    )(h_all, vmask, tril, wa.astype(bf16), ba.reshape(1, H), va.astype(bf16))


# ----------------------------------------------------------------------------
# Pallas kernel 2: fused ctx-broadcast + embed_mlp + rnn_mlp + last_mlp.
# The (B,S,N,H) ctx*d2v intermediate never hits HBM; last_mlp's first layer
# uses split weights to avoid an in-kernel lane concatenation; the final
# 64 -> 1 layer stores a lane-dense (1, tm) row.
# ----------------------------------------------------------------------------
def mlp_kernel(xe_ref, d2v_ref, ctx_ref, rep_ref,
               we1_ref, be1_ref, we2_ref, be2_ref,
               wr_ref, br_ref,
               l1wa_ref, l1wb_ref, l1b_ref,
               l2w_ref, l2b_ref,
               l3w_ref, l3b_ref,
               l4w_ref, l4b_ref,
               out_ref):
    f32, bf16 = jnp.float32, jnp.bfloat16
    tm = xe_ref.shape[0]

    # Replicate each ctx row N-fold via the precomputed bf16 0/1 matmul.
    ctx_b = jnp.dot(rep_ref[...], ctx_ref[...].astype(bf16),
                    preferred_element_type=f32)            # (tm, H)
    xr = ctx_b * d2v_ref[...]                              # fused rnn_step mul (f32 VPU)

    h1 = jnp.maximum(jnp.dot(xe_ref[...].astype(bf16), we1_ref[...],
                             preferred_element_type=f32) + be1_ref[...], 0.0)
    e = jnp.maximum(jnp.dot(h1.astype(bf16), we2_ref[...],
                            preferred_element_type=f32) + be2_ref[...], 0.0)
    rr = jnp.dot(xr.astype(bf16), wr_ref[...],
                 preferred_element_type=f32) + br_ref[...]

    z = jnp.maximum(jnp.dot(e.astype(bf16), l1wa_ref[...], preferred_element_type=f32)
                    + jnp.dot(rr.astype(bf16), l1wb_ref[...], preferred_element_type=f32)
                    + l1b_ref[...], 0.0)                   # cat([e, rr]) @ l1w
    z = jnp.maximum(jnp.dot(z.astype(bf16), l2w_ref[...],
                            preferred_element_type=f32) + l2b_ref[...], 0.0)
    z = jnp.maximum(jnp.dot(z.astype(bf16), l3w_ref[...],
                            preferred_element_type=f32) + l3b_ref[...], 0.0)

    # Final 64 -> 1 layer as (1,64)·(tm,64)^T: lane-dense (1, tm) store.
    y = lax.dot_general(l4w_ref[...], z.astype(bf16), (((1,), (1,)), ((), ())),
                        preferred_element_type=f32)        # (1, tm)
    y = jax.nn.sigmoid(y + l4b_ref[...])
    out_ref[...] = y.reshape(1, 1, tm).astype(out_ref.dtype)


def _pick_tm(M, N, target=1024):
    """Row tile: multiple of 8*N (whole (b,s) groups, sublane aligned), close
    to `target`, dividing M when possible; prefer an even tile count (v7x)."""
    gran = 8 * N
    cap = min(M, max(gran, (target // gran) * gran))
    divisors = [c for c in range(gran, cap + 1, gran) if M % c == 0]
    if divisors:
        even = [c for c in divisors if (M // c) % 2 == 0]
        pool = even if even else divisors
        return max(pool), M
    if M <= target:
        return M, M
    cap = max(gran, (target // gran) * gran)
    return cap, ((M + cap - 1) // cap) * cap               # pad fallback


def fused_mlp(xe, d2v, ctx, p, N):
    M, Edim = xe.shape
    H = d2v.shape[1]
    tm, Mp = _pick_tm(M, N)
    G = tm // N
    if Mp != M:
        pad = Mp - M
        xe = jnp.pad(xe, ((0, pad), (0, 0)))
        d2v = jnp.pad(d2v, ((0, pad), (0, 0)))
        ctx = jnp.pad(ctx, ((0, Mp // N - ctx.shape[0]), (0, 0)))
    n_tiles = Mp // tm

    bf16 = jnp.bfloat16
    b2 = lambda v: v.reshape(1, -1)
    l1wa, l1wb = p["l1w"][:64], p["l1w"][64:]

    # Precomputed 0/1 replication matrix (hoisted out of the kernel, bf16).
    rep = (jnp.arange(tm)[:, None] // N == jnp.arange(G)[None, :]).astype(bf16)

    weights = [rep,
               p["we1"].astype(bf16), b2(p["be1"]),
               p["we2"].astype(bf16), b2(p["be2"]),
               p["wr"].astype(bf16), b2(p["br"]),
               l1wa.astype(bf16), l1wb.astype(bf16), b2(p["l1b"]),
               p["l2w"].astype(bf16), b2(p["l2b"]),
               p["l3w"].astype(bf16), b2(p["l3b"]),
               b2(p["l4w"]).astype(bf16), b2(p["l4b"])]    # l4w as a (1,64) row

    def full(a):
        nd = a.ndim
        return pl.BlockSpec(a.shape, lambda i, _nd=nd: (0,) * _nd)

    in_specs = ([pl.BlockSpec((tm, Edim), lambda i: (i, 0)),
                 pl.BlockSpec((tm, H), lambda i: (i, 0)),
                 pl.BlockSpec((G, H), lambda i: (i, 0))]
                + [full(w) for w in weights])
    out_spec = pl.BlockSpec((1, 1, tm), lambda i: (i, 0, 0))

    out = pl.pallas_call(
        mlp_kernel,
        out_shape=jax.ShapeDtypeStruct((n_tiles, 1, tm), jnp.float32),
        grid=(n_tiles,),
        in_specs=in_specs,
        out_specs=out_spec,
        compiler_params=pltpu.CompilerParams(
            dimension_semantics=("parallel",),
            vmem_limit_bytes=_VMEM_LIMIT),
    )(xe, d2v, ctx, *weights)
    return out.reshape(Mp)[:M]


# ----------------------------------------------------------------------------
# Full forward pass (HRAMModel.forward equivalent).
# ----------------------------------------------------------------------------
@jax.jit
def hram_forward(params, x1, seq_lens, user_ids, sample_ids, sample_d2v):
    B, S, _ = x1.shape
    N = sample_ids.shape[2]
    H = sample_d2v.shape[-1]
    Edim = params["embed_user"].shape[1]
    seq_lens = seq_lens.astype(jnp.int32)

    # Embedding lookups + user*sample interaction (glue; Edim is tiny).
    user_embed = params["embed_user"][user_ids]             # (B, Edim)
    sample_embed = params["embed_article"][sample_ids]      # (B, S, N, Edim)
    xe = user_embed[:, None, None, :] * sample_embed        # (B, S, N, Edim)

    # Bi-LSTM over the clicked-article sequence.
    h_all = bilstm(x1, seq_lens, params["lstm"])            # (B, S, H)

    # Batched causal attention (Pallas) -> (B, S, H), zeroed past seq_len.
    ctx = attention_context(h_all, seq_lens,
                            params["attn_w1"], params["attn_b1"],
                            params["attn_w2"])

    # Fused MLP stack (Pallas); the ctx x sample_d2v broadcast happens inside
    # the kernel, so no (B,S,N,H) intermediate hits HBM.
    M = B * S * N
    out = fused_mlp(xe.reshape(M, Edim),
                    sample_d2v.reshape(M, H),
                    ctx.reshape(B * S, H), params, N)
    return out.reshape(B, S, N)


# ----------------------------------------------------------------------------
if __name__ == "__main__":
    B, S, E = 2, 8, 16          # batch, max_seq_length, x1 embed_size
    hidden = 32                 # d2v_embed (LSTM output size, bi: 2 * 16)
    num_layers = 2
    emb_dim = 8                 # user / article embedding_dim
    user_size, article_size, pad_idx = 10, 20, 0
    N = 4                       # candidate samples per step

    key = jax.random.PRNGKey(0)
    kp, kx, ku, ki, kd = jax.random.split(key, 5)
    params = init_params(kp, E, hidden, num_layers, user_size,
                         article_size, pad_idx, emb_dim)

    x1 = jax.random.normal(kx, (B, S, E), jnp.float32)
    seq_lens = jnp.array([8, 5], jnp.int32)   # sorted descending (pack semantics)
    user_ids = jax.random.randint(ku, (B,), 0, user_size)
    sample_ids = jax.random.randint(ki, (B, S, N), 0, article_size)
    sample_d2v = jax.random.normal(kd, (B, S, N, hidden), jnp.float32)

    out = hram_forward(params, x1, seq_lens, user_ids, sample_ids, sample_d2v)
    out = jax.block_until_ready(out)
    assert out.shape == (B, S, N)
    assert bool(jnp.all(jnp.isfinite(out)))
    assert bool(jnp.all((out >= 0.0) & (out <= 1.0)))   # sigmoid range
    print("KERNEL_OK")
</pallas_src>

<mosaic_0001>
module attributes {stable_mosaic.version = 11 : i64} {
  func.func @attn_kernel(%arg0: i32, %arg1: memref<1x8x32xf32, #tpu.memory_space<vmem>>, %arg2: memref<1x8x1xf32, #tpu.memory_space<vmem>>, %arg3: memref<8x8xbf16, #tpu.memory_space<vmem>>, %arg4: memref<32x32xbf16, #tpu.memory_space<vmem>>, %arg5: memref<1x32xf32, #tpu.memory_space<vmem>>, %arg6: memref<32x1xbf16, #tpu.memory_space<vmem>>, %arg7: memref<1x8x32xf32, #tpu.memory_space<vmem>>) attributes {dimension_semantics = [#tpu.dimension_semantics<parallel>], iteration_bounds = array<i64: 2>, scalar_prefetch = 0 : i64, scratch_operands = 0 : i64, tpu.core_type = #tpu.core_type<tc>, window_params = [{transform_indices = @transform_0, window_bounds = array<i64: 1, 8, 32>}, {transform_indices = @transform_1, window_bounds = array<i64: 1, 8, 1>}, {pipeline_mode = #tpu.pipeline_mode<synchronous>, transform_indices = @transform_2, window_bounds = array<i64: 8, 8>}, {pipeline_mode = #tpu.pipeline_mode<synchronous>, transform_indices = @transform_3, window_bounds = array<i64: 32, 32>}, {pipeline_mode = #tpu.pipeline_mode<synchronous>, transform_indices = @transform_4, window_bounds = array<i64: 1, 32>}, {pipeline_mode = #tpu.pipeline_mode<synchronous>, transform_indices = @transform_5, window_bounds = array<i64: 32, 1>}, {transform_indices = @transform_6, window_bounds = array<i64: 1, 8, 32>}]} {
    %c0 = arith.constant 0 : index
    %c0_0 = arith.constant 0 : index
    %c0_1 = arith.constant 0 : index
    %0 = vector.load %arg1[%c0, %c0_0, %c0_1] : memref<1x8x32xf32, #tpu.memory_space<vmem>>, vector<1x8x32xf32>
    %c0_2 = arith.constant 0 : index
    %c0_3 = arith.constant 0 : index
    %c0_4 = arith.constant 0 : index
    %1 = vector.load %arg2[%c0_2, %c0_3, %c0_4] : memref<1x8x1xf32, #tpu.memory_space<vmem>>, vector<1x8x1xf32>
    %2 = vector.shape_cast %0 : vector<1x8x32xf32> to vector<8x32xf32>
    %3 = arith.truncf %2 : vector<8x32xf32> to vector<8x32xbf16>
    %c0_5 = arith.constant 0 : index
    %c0_6 = arith.constant 0 : index
    %4 = vector.load %arg4[%c0_5, %c0_6] : memref<32x32xbf16, #tpu.memory_space<vmem>>, vector<32x32xbf16>
    %cst = arith.constant dense<0.000000e+00> : vector<8x32xf32>
    %5 = tpu.matmul %3, %4, %cst {dimension_numbers = #tpu.dot_dimension_numbers<[1], [0], [0], [1], [0, 0, 1, 1], [], []>} : vector<8x32xbf16>, vector<32x32xbf16>, vector<8x32xf32> -> vector<8x32xf32>
    %c0_7 = arith.constant 0 : index
    %c0_8 = arith.constant 0 : index
    %6 = vector.load %arg5[%c0_7, %c0_8] : memref<1x32xf32, #tpu.memory_space<vmem>>, vector<1x32xf32>
    %7 = vector.broadcast %6 : vector<1x32xf32> to vector<8x32xf32>
    %8 = arith.addf %5, %7 : vector<8x32xf32>
    %9 = math.tanh %8 : vector<8x32xf32>
    %10 = arith.truncf %9 : vector<8x32xf32> to vector<8x32xbf16>
    %c0_9 = arith.constant 0 : index
    %c0_10 = arith.constant 0 : index
    %11 = vector.load %arg6[%c0_9, %c0_10] : memref<32x1xbf16, #tpu.memory_space<vmem>>, vector<32x1xbf16>
    %cst_11 = arith.constant dense<0.000000e+00> : vector<8x1xf32>
    %12 = tpu.matmul %10, %11, %cst_11 {dimension_numbers = #tpu.dot_dimension_numbers<[1], [0], [0], [1], [0, 0, 1, 1], [], []>} : vector<8x32xbf16>, vector<32x1xbf16>, vector<8x1xf32> -> vector<8x1xf32>
    %13 = vector.shape_cast %12 : vector<8x1xf32> to vector<1x8x1xf32>
    %cst_12 = arith.constant 5.000000e-01 : f32
    %14 = vector.broadcast %cst_12 : f32 to vector<1x8x1xf32>
    %15 = arith.cmpf ogt, %1, %14 : vector<1x8x1xf32>
    %cst_13 = arith.constant -1.000000e+30 : f32
    %16 = vector.broadcast %cst_13 : f32 to vector<1x8x1xf32>
    %17 = arith.select %15, %13, %16 : vector<1x8x1xi1>, vector<1x8x1xf32>
    %cst_14 = arith.constant dense<0xFF800000> : vector<1x1xf32>
    %18 = vector.multi_reduction <maximumf>, %17, %cst_14 [1] : vector<1x8x1xf32> to vector<1x1xf32>
    %19 = vector.shape_cast %18 : vector<1x1xf32> to vector<1x1x1xf32>
    %20 = vector.broadcast %19 : vector<1x1x1xf32> to vector<1x8x1xf32>
    %21 = arith.subf %17, %20 : vector<1x8x1xf32>
    %22 = math.exp %21 : vector<1x8x1xf32>
    %23 = arith.mulf %22, %1 : vector<1x8x1xf32>
    %c0_15 = arith.constant 0 : index
    %c0_16 = arith.constant 0 : index
    %24 = vector.load %arg3[%c0_15, %c0_16] : memref<8x8xbf16, #tpu.memory_space<vmem>>, vector<8x8xbf16>
    %25 = vector.shape_cast %24 : vector<8x8xbf16> to vector<1x8x8xbf16>
    %26 = vector.broadcast %23 : vector<1x8x1xf32> to vector<1x8x32xf32>
    %27 = arith.mulf %26, %0 : vector<1x8x32xf32>
    %28 = arith.truncf %27 : vector<1x8x32xf32> to vector<1x8x32xbf16>
    %cst_17 = arith.constant dense<0.000000e+00> : vector<1x8x32xf32>
    %29 = tpu.matmul %25, %28, %cst_17 {dimension_numbers = #tpu.dot_dimension_numbers<[2], [1], [1], [2], [0, 0, 0, 1, 1, 2], [0], [0]>} : vector<1x8x8xbf16>, vector<1x8x32xbf16>, vector<1x8x32xf32> -> vector<1x8x32xf32>
    %30 = arith.truncf %23 : vector<1x8x1xf32> to vector<1x8x1xbf16>
    %cst_18 = arith.constant dense<0.000000e+00> : vector<1x8x1xf32>
    %31 = tpu.matmul %25, %30, %cst_18 {dimension_numbers = #tpu.dot_dimension_numbers<[2], [1], [1], [2], [0, 0, 0, 1, 1, 2], [0], [0]>} : vector<1x8x8xbf16>, vector<1x8x1xbf16>, vector<1x8x1xf32> -> vector<1x8x1xf32>
    %cst_19 = arith.constant 1.000000e-30 : f32
    %32 = vector.broadcast %cst_19 : f32 to vector<1x8x1xf32>
    %33 = arith.maximumf %31, %32 : vector<1x8x1xf32>
    %34 = tpu.reciprocal %33 {approx = true} : vector<1x8x1xf32> -> vector<1x8x1xf32>
    %35 = vector.broadcast %34 : vector<1x8x1xf32> to vector<1x8x32xf32>
    %36 = arith.mulf %29, %35 : vector<1x8x32xf32>
    %37 = vector.broadcast %1 : vector<1x8x1xf32> to vector<1x8x32xf32>
    %38 = arith.mulf %36, %37 : vector<1x8x32xf32>
    %c0_20 = arith.constant 0 : index
    %c0_21 = arith.constant 0 : index
    %c0_22 = arith.constant 0 : index
    %39 = vector.load %arg7[%c0_20, %c0_21, %c0_22] : memref<1x8x32xf32, #tpu.memory_space<vmem>>, vector<1x8x32xf32>
    tpu.vector_store %arg7[%c0_20, %c0_21, %c0_22], %38 {strides = array<i32>} : memref<1x8x32xf32, #tpu.memory_space<vmem>>, vector<1x8x32xf32>,
    return
  }
  func.func @transform_0(%arg0: i32) -> (i32, i32, i32) {
    %c0_i32 = arith.constant 0 : i32
    %c0_i32_0 = arith.constant 0 : i32
    %c0_i32_1 = arith.constant 0 : i32
    return %arg0, %c0_i32, %c0_i32_0 : i32, i32, i32
  }
  func.func @transform_1(%arg0: i32) -> (i32, i32, i32) {
    %c0_i32 = arith.constant 0 : i32
    %c0_i32_0 = arith.constant 0 : i32
    %c0_i32_1 = arith.constant 0 : i32
    return %arg0, %c0_i32, %c0_i32_0 : i32, i32, i32
  }
  func.func @transform_2(%arg0: i32) -> (i32, i32) {
    %c0_i32 = arith.constant 0 : i32
    %c0_i32_0 = arith.constant 0 : i32
    %c0_i32_1 = arith.constant 0 : i32
    return %c0_i32, %c0_i32_0 : i32, i32
  }
  func.func @transform_3(%arg0: i32) -> (i32, i32) {
    %c0_i32 = arith.constant 0 : i32
    %c0_i32_0 = arith.constant 0 : i32
    %c0_i32_1 = arith.constant 0 : i32
    return %c0_i32, %c0_i32_0 : i32, i32
  }
  func.func @transform_4(%arg0: i32) -> (i32, i32) {
    %c0_i32 = arith.constant 0 : i32
    %c0_i32_0 = arith.constant 0 : i32
    %c0_i32_1 = arith.constant 0 : i32
    return %c0_i32, %c0_i32_0 : i32, i32
  }
  func.func @transform_5(%arg0: i32) -> (i32, i32) {
    %c0_i32 = arith.constant 0 : i32
    %c0_i32_0 = arith.constant 0 : i32
    %c0_i32_1 = arith.constant 0 : i32
    return %c0_i32, %c0_i32_0 : i32, i32
  }
  func.func @transform_6(%arg0: i32) -> (i32, i32, i32) {
    %c0_i32 = arith.constant 0 : i32
    %c0_i32_0 = arith.constant 0 : i32
    %c0_i32_1 = arith.constant 0 : i32
    return %arg0, %c0_i32, %c0_i32_0 : i32, i32, i32
  }
}

module attributes {stable_mosaic.version = 11 : i64} {
  func.func @mlp_kernel(%arg0: i32, %arg1: memref<32x8xf32, #tpu.memory_space<vmem>>, %arg2: memref<32x32xf32, #tpu.memory_space<vmem>>, %arg3: memref<8x32xf32, #tpu.memory_space<vmem>>, %arg4: memref<32x8xbf16, #tpu.memory_space<vmem>>, %arg5: memref<8x128xbf16, #tpu.memory_space<vmem>>, %arg6: memref<1x128xf32, #tpu.memory_space<vmem>>, %arg7: memref<128x64xbf16, #tpu.memory_space<vmem>>, %arg8: memref<1x64xf32, #tpu.memory_space<vmem>>, %arg9: memref<32x64xbf16, #tpu.memory_space<vmem>>, %arg10: memref<1x64xf32, #tpu.memory_space<vmem>>, %arg11: memref<64x256xbf16, #tpu.memory_space<vmem>>, %arg12: memref<64x256xbf16, #tpu.memory_space<vmem>>, %arg13: memref<1x256xf32, #tpu.memory_space<vmem>>, %arg14: memref<256x128xbf16, #tpu.memory_space<vmem>>, %arg15: memref<1x128xf32, #tpu.memory_space<vmem>>, %arg16: memref<128x64xbf16, #tpu.memory_space<vmem>>, %arg17: memref<1x64xf32, #tpu.memory_space<vmem>>, %arg18: memref<1x64xbf16, #tpu.memory_space<vmem>>, %arg19: memref<1x1xf32, #tpu.memory_space<vmem>>, %arg20: memref<1x1x32xf32, #tpu.memory_space<vmem>>) attributes {dimension_semantics = [#tpu.dimension_semantics<parallel>], iteration_bounds = array<i64: 2>, scalar_prefetch = 0 : i64, scratch_operands = 0 : i64, tpu.core_type = #tpu.core_type<tc>, window_params = [{transform_indices = @transform_0, window_bounds = array<i64: 32, 8>}, {transform_indices = @transform_1, window_bounds = array<i64: 32, 32>}, {transform_indices = @transform_2, window_bounds = array<i64: 8, 32>}, {pipeline_mode = #tpu.pipeline_mode<synchronous>, transform_indices = @transform_3, window_bounds = array<i64: 32, 8>}, {pipeline_mode = #tpu.pipeline_mode<synchronous>, transform_indices = @transform_4, window_bounds = array<i64: 8, 128>}, {pipeline_mode = #tpu.pipeline_mode<synchronous>, transform_indices = @transform_5, window_bounds = array<i64: 1, 128>}, {pipeline_mode = #tpu.pipeline_mode<synchronous>, transform_indices = @transform_6, window_bounds = array<i64: 128, 64>}, {pipeline_mode = #tpu.pipeline_mode<synchronous>, transform_indices = @transform_7, window_bounds = array<i64: 1, 64>}, {pipeline_mode = #tpu.pipeline_mode<synchronous>, transform_indices = @transform_8, window_bounds = array<i64: 32, 64>}, {pipeline_mode = #tpu.pipeline_mode<synchronous>, transform_indices = @transform_9, window_bounds = array<i64: 1, 64>}, {pipeline_mode = #tpu.pipeline_mode<synchronous>, transform_indices = @transform_10, window_bounds = array<i64: 64, 256>}, {pipeline_mode = #tpu.pipeline_mode<synchronous>, transform_indices = @transform_11, window_bounds = array<i64: 64, 256>}, {pipeline_mode = #tpu.pipeline_mode<synchronous>, transform_indices = @transform_12, window_bounds = array<i64: 1, 256>}, {pipeline_mode = #tpu.pipeline_mode<synchronous>, transform_indices = @transform_13, window_bounds = array<i64: 256, 128>}, {pipeline_mode = #tpu.pipeline_mode<synchronous>, transform_indices = @transform_14, window_bounds = array<i64: 1, 128>}, {pipeline_mode = #tpu.pipeline_mode<synchronous>, transform_indices = @transform_15, window_bounds = array<i64: 128, 64>}, {pipeline_mode = #tpu.pipeline_mode<synchronous>, transform_indices = @transform_16, window_bounds = array<i64: 1, 64>}, {pipeline_mode = #tpu.pipeline_mode<synchronous>, transform_indices = @transform_17, window_bounds = array<i64: 1, 64>}, {pipeline_mode = #tpu.pipeline_mode<synchronous>, transform_indices = @transform_18, window_bounds = array<i64: 1, 1>}, {transform_indices = @transform_19, window_bounds = array<i64: 1, 1, 32>}]} {
    %c0 = arith.constant 0 : index
    %c0_0 = arith.constant 0 : index
    %0 = vector.load %arg4[%c0, %c0_0] : memref<32x8xbf16, #tpu.memory_space<vmem>>, vector<32x8xbf16>
    %c0_1 = arith.constant 0 : index
    %c0_2 = arith.constant 0 : index
    %1 = vector.load %arg3[%c0_1, %c0_2] : memref<8x32xf32, #tpu.memory_space<vmem>>, vector<8x32xf32>
    %2 = arith.truncf %1 : vector<8x32xf32> to vector<8x32xbf16>
    %cst = arith.constant dense<0.000000e+00> : vector<32x32xf32>
    %3 = tpu.matmul %0, %2, %cst {dimension_numbers = #tpu.dot_dimension_numbers<[1], [0], [0], [1], [0, 0, 1, 1], [], []>} : vector<32x8xbf16>, vector<8x32xbf16>, vector<32x32xf32> -> vector<32x32xf32>
    %c0_3 = arith.constant 0 : index
    %c0_4 = arith.constant 0 : index
    %4 = vector.load %arg2[%c0_3, %c0_4] : memref<32x32xf32, #tpu.memory_space<vmem>>, vector<32x32xf32>
    %5 = arith.mulf %3, %4 : vector<32x32xf32>
    %c0_5 = arith.constant 0 : index
    %c0_6 = arith.constant 0 : index
    %6 = vector.load %arg1[%c0_5, %c0_6] : memref<32x8xf32, #tpu.memory_space<vmem>>, vector<32x8xf32>
    %7 = arith.truncf %6 : vector<32x8xf32> to vector<32x8xbf16>
    %c0_7 = arith.constant 0 : index
    %c0_8 = arith.constant 0 : index
    %8 = vector.load %arg5[%c0_7, %c0_8] : memref<8x128xbf16, #tpu.memory_space<vmem>>, vector<8x128xbf16>
    %cst_9 = arith.constant dense<0.000000e+00> : vector<32x128xf32>
    %9 = tpu.matmul %7, %8, %cst_9 {dimension_numbers = #tpu.dot_dimension_numbers<[1], [0], [0], [1], [0, 0, 1, 1], [], []>} : vector<32x8xbf16>, vector<8x128xbf16>, vector<32x128xf32> -> vector<32x128xf32>
    %c0_10 = arith.constant 0 : index
    %c0_11 = arith.constant 0 : index
    %10 = vector.load %arg6[%c0_10, %c0_11] : memref<1x128xf32, #tpu.memory_space<vmem>>, vector<1x128xf32>
    %11 = vector.broadcast %10 : vector<1x128xf32> to vector<32x128xf32>
    %12 = arith.addf %9, %11 : vector<32x128xf32>
    %cst_12 = arith.constant 0.000000e+00 : f32
    %13 = vector.broadcast %cst_12 : f32 to vector<32x128xf32>
    %14 = arith.maximumf %12, %13 : vector<32x128xf32>
    %15 = arith.truncf %14 : vector<32x128xf32> to vector<32x128xbf16>
    %c0_13 = arith.constant 0 : index
    %c0_14 = arith.constant 0 : index
    %16 = vector.load %arg7[%c0_13, %c0_14] : memref<128x64xbf16, #tpu.memory_space<vmem>>, vector<128x64xbf16>
    %cst_15 = arith.constant dense<0.000000e+00> : vector<32x64xf32>
    %17 = tpu.matmul %15, %16, %cst_15 {dimension_numbers = #tpu.dot_dimension_numbers<[1], [0], [0], [1], [0, 0, 1, 1], [], []>} : vector<32x128xbf16>, vector<128x64xbf16>, vector<32x64xf32> -> vector<32x64xf32>
    %c0_16 = arith.constant 0 : index
    %c0_17 = arith.constant 0 : index
    %18 = vector.load %arg8[%c0_16, %c0_17] : memref<1x64xf32, #tpu.memory_space<vmem>>, vector<1x64xf32>
    %19 = vector.broadcast %18 : vector<1x64xf32> to vector<32x64xf32>
    %20 = arith.addf %17, %19 : vector<32x64xf32>
    %cst_18 = arith.constant 0.000000e+00 : f32
    %21 = vector.broadcast %cst_18 : f32 to vector<32x64xf32>
    %22 = arith.maximumf %20, %21 : vector<32x64xf32>
    %23 = arith.truncf %5 : vector<32x32xf32> to vector<32x32xbf16>
    %c0_19 = arith.constant 0 : index
    %c0_20 = arith.constant 0 : index
    %24 = vector.load %arg9[%c0_19, %c0_20] : memref<32x64xbf16, #tpu.memory_space<vmem>>, vector<32x64xbf16>
    %cst_21 = arith.constant dense<0.000000e+00> : vector<32x64xf32>
    %25 = tpu.matmul %23, %24, %cst_21 {dimension_numbers = #tpu.dot_dimension_numbers<[1], [0], [0], [1], [0, 0, 1, 1], [], []>} : vector<32x32xbf16>, vector<32x64xbf16>, vector<32x64xf32> -> vector<32x64xf32>
    %c0_22 = arith.constant 0 : index
    %c0_23 = arith.constant 0 : index
    %26 = vector.load %arg10[%c0_22, %c0_23] : memref<1x64xf32, #tpu.memory_space<vmem>>, vector<1x64xf32>
    %27 = vector.broadcast %26 : vector<1x64xf32> to vector<32x64xf32>
    %28 = arith.addf %25, %27 : vector<32x64xf32>
    %29 = arith.truncf %22 : vector<32x64xf32> to vector<32x64xbf16>
    %c0_24 = arith.constant 0 : index
    %c0_25 = arith.constant 0 : index
    %30 = vector.load %arg11[%c0_24, %c0_25] : memref<64x256xbf16, #tpu.memory_space<vmem>>, vector<64x256xbf16>
    %cst_26 = arith.constant dense<0.000000e+00> : vector<32x256xf32>
    %31 = tpu.matmul %29, %30, %cst_26 {dimension_numbers = #tpu.dot_dimension_numbers<[1], [0], [0], [1], [0, 0, 1, 1], [], []>} : vector<32x64xbf16>, vector<64x256xbf16>, vector<32x256xf32> -> vector<32x256xf32>
    %32 = arith.truncf %28 : vector<32x64xf32> to vector<32x64xbf16>
    %c0_27 = arith.constant 0 : index
    %c0_28 = arith.constant 0 : index
    %33 = vector.load %arg12[%c0_27, %c0_28] : memref<64x256xbf16, #tpu.memory_space<vmem>>, vector<64x256xbf16>
    %cst_29 = arith.constant dense<0.000000e+00> : vector<32x256xf32>
    %34 = tpu.matmul %32, %33, %cst_29 {dimension_numbers = #tpu.dot_dimension_numbers<[1], [0], [0], [1], [0, 0, 1, 1], [], []>} : vector<32x64xbf16>, vector<64x256xbf16>, vector<32x256xf32> -> vector<32x256xf32>
    %35 = arith.addf %31, %34 : vector<32x256xf32>
    %c0_30 = arith.constant 0 : index
    %c0_31 = arith.constant 0 : index
    %36 = vector.load %arg13[%c0_30, %c0_31] : memref<1x256xf32, #tpu.memory_space<vmem>>, vector<1x256xf32>
    %37 = vector.broadcast %36 : vector<1x256xf32> to vector<32x256xf32>
    %38 = arith.addf %35, %37 : vector<32x256xf32>
    %cst_32 = arith.constant 0.000000e+00 : f32
    %39 = vector.broadcast %cst_32 : f32 to vector<32x256xf32>
    %40 = arith.maximumf %38, %39 : vector<32x256xf32>
    %41 = arith.truncf %40 : vector<32x256xf32> to vector<32x256xbf16>
    %c0_33 = arith.constant 0 : index
    %c0_34 = arith.constant 0 : index
    %42 = vector.load %arg14[%c0_33, %c0_34] : memref<256x128xbf16, #tpu.memory_space<vmem>>, vector<256x128xbf16>
    %cst_35 = arith.constant dense<0.000000e+00> : vector<32x128xf32>
    %43 = tpu.matmul %41, %42, %cst_35 {dimension_numbers = #tpu.dot_dimension_numbers<[1], [0], [0], [1], [0, 0, 1, 1], [], []>} : vector<32x256xbf16>, vector<256x128xbf16>, vector<32x128xf32> -> vector<32x128xf32>
    %c0_36 = arith.constant 0 : index
    %c0_37 = arith.constant 0 : index
    %44 = vector.load %arg15[%c0_36, %c0_37] : memref<1x128xf32, #tpu.memory_space<vmem>>, vector<1x128xf32>
    %45 = vector.broadcast %44 : vector<1x128xf32> to vector<32x128xf32>
    %46 = arith.addf %43, %45 : vector<32x128xf32>
    %cst_38 = arith.constant 0.000000e+00 : f32
    %47 = vector.broadcast %cst_38 : f32 to vector<32x128xf32>
    %48 = arith.maximumf %46, %47 : vector<32x128xf32>
    %49 = arith.truncf %48 : vector<32x128xf32> to vector<32x128xbf16>
    %c0_39 = arith.constant 0 : index
    %c0_40 = arith.constant 0 : index
    %50 = vector.load %arg16[%c0_39, %c0_40] : memref<128x64xbf16, #tpu.memory_space<vmem>>, vector<128x64xbf16>
    %cst_41 = arith.constant dense<0.000000e+00> : vector<32x64xf32>
    %51 = tpu.matmul %49, %50, %cst_41 {dimension_numbers = #tpu.dot_dimension_numbers<[1], [0], [0], [1], [0, 0, 1, 1], [], []>} : vector<32x128xbf16>, vector<128x64xbf16>, vector<32x64xf32> -> vector<32x64xf32>
    %c0_42 = arith.constant 0 : index
    %c0_43 = arith.constant 0 : index
    %52 = vector.load %arg17[%c0_42, %c0_43] : memref<1x64xf32, #tpu.memory_space<vmem>>, vector<1x64xf32>
    %53 = vector.broadcast %52 : vector<1x64xf32> to vector<32x64xf32>
    %54 = arith.addf %51, %53 : vector<32x64xf32>
    %cst_44 = arith.constant 0.000000e+00 : f32
    %55 = vector.broadcast %cst_44 : f32 to vector<32x64xf32>
    %56 = arith.maximumf %54, %55 : vector<32x64xf32>
    %c0_45 = arith.constant 0 : index
    %c0_46 = arith.constant 0 : index
    %57 = vector.load %arg18[%c0_45, %c0_46] : memref<1x64xbf16, #tpu.memory_space<vmem>>, vector<1x64xbf16>
    %58 = arith.truncf %56 : vector<32x64xf32> to vector<32x64xbf16>
    %cst_47 = arith.constant dense<0.000000e+00> : vector<1x32xf32>
    %59 = tpu.matmul %57, %58, %cst_47 {dimension_numbers = #tpu.dot_dimension_numbers<[1], [1], [0], [0], [0, 0, 1, 0], [], []>} : vector<1x64xbf16>, vector<32x64xbf16>, vector<1x32xf32> -> vector<1x32xf32>
    %c0_48 = arith.constant 0 : index
    %c0_49 = arith.constant 0 : index
    %60 = vector.load %arg19[%c0_48, %c0_49] : memref<1x1xf32, #tpu.memory_space<vmem>>, vector<1x1xf32>
    %61 = vector.broadcast %60 : vector<1x1xf32> to vector<1x32xf32>
    %62 = arith.addf %59, %61 : vector<1x32xf32>
    %63 = arith.negf %62 : vector<1x32xf32>
    %64 = math.exp %63 : vector<1x32xf32>
    %cst_50 = arith.constant 1.000000e+00 : f32
    %65 = vector.broadcast %cst_50 : f32 to vector<1x32xf32>
    %66 = arith.addf %65, %64 : vector<1x32xf32>
    %67 = arith.divf %65, %66 : vector<1x32xf32>
    %68 = vector.shape_cast %67 : vector<1x32xf32> to vector<1x1x32xf32>
    %c0_51 = arith.constant 0 : index
    %c0_52 = arith.constant 0 : index
    %c0_53 = arith.constant 0 : index
    %69 = vector.load %arg20[%c0_51, %c0_52, %c0_53] : memref<1x1x32xf32, #tpu.memory_space<vmem>>, vector<1x1x32xf32>
    tpu.vector_store %arg20[%c0_51, %c0_52, %c0_53], %68 {strides = array<i32>} : memref<1x1x32xf32, #tpu.memory_space<vmem>>, vector<1x1x32xf32>,
    return
  }
  func.func @transform_0(%arg0: i32) -> (i32, i32) {
    %c0_i32 = arith.constant 0 : i32
    %c0_i32_0 = arith.constant 0 : i32
    return %arg0, %c0_i32 : i32, i32
  }
  func.func @transform_1(%arg0: i32) -> (i32, i32) {
    %c0_i32 = arith.constant 0 : i32
    %c0_i32_0 = arith.constant 0 : i32
    return %arg0, %c0_i32 : i32, i32
  }
  func.func @transform_2(%arg0: i32) -> (i32, i32) {
    %c0_i32 = arith.constant 0 : i32
    %c0_i32_0 = arith.constant 0 : i32
    return %arg0, %c0_i32 : i32, i32
  }
  func.func @transform_3(%arg0: i32) -> (i32, i32) {
    %c0_i32 = arith.constant 0 : i32
    %c0_i32_0 = arith.constant 0 : i32
    %c0_i32_1 = arith.constant 0 : i32
    return %c0_i32, %c0_i32_0 : i32, i32
  }
  func.func @transform_4(%arg0: i32) -> (i32, i32) {
    %c0_i32 = arith.constant 0 : i32
    %c0_i32_0 = arith.constant 0 : i32
    %c0_i32_1 = arith.constant 0 : i32
    return %c0_i32, %c0_i32_0 : i32, i32
  }
  func.func @transform_5(%arg0: i32) -> (i32, i32) {
    %c0_i32 = arith.constant 0 : i32
    %c0_i32_0 = arith.constant 0 : i32
    %c0_i32_1 = arith.constant 0 : i32
    return %c0_i32, %c0_i32_0 : i32, i32
  }
  func.func @transform_6(%arg0: i32) -> (i32, i32) {
    %c0_i32 = arith.constant 0 : i32
    %c0_i32_0 = arith.constant 0 : i32
    %c0_i32_1 = arith.constant 0 : i32
    return %c0_i32, %c0_i32_0 : i32, i32
  }
  func.func @transform_7(%arg0: i32) -> (i32, i32) {
    %c0_i32 = arith.constant 0 : i32
    %c0_i32_0 = arith.constant 0 : i32
    %c0_i32_1 = arith.constant 0 : i32
    return %c0_i32, %c0_i32_0 : i32, i32
  }
  func.func @transform_8(%arg0: i32) -> (i32, i32) {
    %c0_i32 = arith.constant 0 : i32
    %c0_i32_0 = arith.constant 0 : i32
    %c0_i32_1 = arith.constant 0 : i32
    return %c0_i32, %c0_i32_0 : i32, i32
  }
  func.func @transform_9(%arg0: i32) -> (i32, i32) {
    %c0_i32 = arith.constant 0 : i32
    %c0_i32_0 = arith.constant 0 : i32
    %c0_i32_1 = arith.constant 0 : i32
    return %c0_i32, %c0_i32_0 : i32, i32
  }
  func.func @transform_10(%arg0: i32) -> (i32, i32) {
    %c0_i32 = arith.constant 0 : i32
    %c0_i32_0 = arith.constant 0 : i32
    %c0_i32_1 = arith.constant 0 : i32
    return %c0_i32, %c0_i32_0 : i32, i32
  }
  func.func @transform_11(%arg0: i32) -> (i32, i32) {
    %c0_i32 = arith.constant 0 : i32
    %c0_i32_0 = arith.constant 0 : i32
    %c0_i32_1 = arith.constant 0 : i32
    return %c0_i32, %c0_i32_0 : i32, i32
  }
  func.func @transform_12(%arg0: i32) -> (i32, i32) {
    %c0_i32 = arith.constant 0 : i32
    %c0_i32_0 = arith.constant 0 : i32
    %c0_i32_1 = arith.constant 0 : i32
    return %c0_i32, %c0_i32_0 : i32, i32
  }
  func.func @transform_13(%arg0: i32) -> (i32, i32) {
    %c0_i32 = arith.constant 0 : i32
    %c0_i32_0 = arith.constant 0 : i32
    %c0_i32_1 = arith.constant 0 : i32
    return %c0_i32, %c0_i32_0 : i32, i32
  }
  func.func @transform_14(%arg0: i32) -> (i32, i32) {
    %c0_i32 = arith.constant 0 : i32
    %c0_i32_0 = arith.constant 0 : i32
    %c0_i32_1 = arith.constant 0 : i32
    return %c0_i32, %c0_i32_0 : i32, i32
  }
  func.func @transform_15(%arg0: i32) -> (i32, i32) {
    %c0_i32 = arith.constant 0 : i32
    %c0_i32_0 = arith.constant 0 : i32
    %c0_i32_1 = arith.constant 0 : i32
    return %c0_i32, %c0_i32_0 : i32, i32
  }
  func.func @transform_16(%arg0: i32) -> (i32, i32) {
    %c0_i32 = arith.constant 0 : i32
    %c0_i32_0 = arith.constant 0 : i32
    %c0_i32_1 = arith.constant 0 : i32
    return %c0_i32, %c0_i32_0 : i32, i32
  }
  func.func @transform_17(%arg0: i32) -> (i32, i32) {
    %c0_i32 = arith.constant 0 : i32
    %c0_i32_0 = arith.constant 0 : i32
    %c0_i32_1 = arith.constant 0 : i32
    return %c0_i32, %c0_i32_0 : i32, i32
  }
  func.func @transform_18(%arg0: i32) -> (i32, i32) {
    %c0_i32 = arith.constant 0 : i32
    %c0_i32_0 = arith.constant 0 : i32
    %c0_i32_1 = arith.constant 0 : i32
    return %c0_i32, %c0_i32_0 : i32, i32
  }
  func.func @transform_19(%arg0: i32) -> (i32, i32, i32) {
    %c0_i32 = arith.constant 0 : i32
    %c0_i32_0 = arith.constant 0 : i32
    %c0_i32_1 = arith.constant 0 : i32
    return %arg0, %c0_i32, %c0_i32_0 : i32, i32, i32
  }
}

</mosaic_0001>

<bundles_post_ra>
// kernel: custom-call.1
= control target key start
LH: loop header
LB: loop body
LE: loop exit
PB: predicated region body
PF: predicated region fallthrough
CT: control target
= control target key end

     0   :  { %s6_s0 = inlined_call_operand.vmem [shape: f32[2,2,16], index: 0, kind: output, shape index: {}]  }

// kernel: custom-call
= control target key start
LH: loop header
LB: loop body
LE: loop exit
PB: predicated region body
PF: predicated region fallthrough
CT: control target
= control target key end

     0   :  { %s6_s0 = inlined_call_operand.vmem [shape: bf16[2,2,16], index: 0, kind: output, shape index: {}]  }

// kernel: custom-call.8
= control target key start
LH: loop header
LB: loop body
LE: loop exit
PB: predicated region body
PF: predicated region fallthrough
CT: control target
= control target key end

     0   :  { %s6_s0 = inlined_call_operand.vmem [shape: f32[8,2,2,16], index: 0, kind: output, shape index: {}]  }

// kernel: hram_forward.2
= control target key start
LH: loop header
LB: loop body
LE: loop exit
PB: predicated region body
PF: predicated region fallthrough
CT: control target
= control target key end

     0   :  { %s575_s21 = smov 0   ;;  %s621_s0 = inlined_call_operand.vmem [shape: f32[2,8,32], index: 0, kind: input, shape index: {}]   ;;  %s622_s1 = inlined_call_operand.vmem [shape: f32[2,8,1], index: 1, kind: input, shape index: {}]   ;;  %s623_s2 = inlined_call_operand.vmem [shape: bf16[8,8], index: 2, kind: input, shape index: {}]   ;;  %s624_s3 = inlined_call_operand.vmem [shape: bf16[32,32], index: 3, kind: input, shape index: {}]   ;;  %s625_s4 = inlined_call_operand.vmem [shape: f32[1,32], index: 4, kind: input, shape index: {}]   ;;  %s626_s5 = inlined_call_operand.vmem [shape: bf16[32,1], index: 5, kind: input, shape index: {}]   ;;  %s627_s6 = inlined_call_operand.vmem [shape: f32[2,8,32], index: 6, kind: output, shape index: {}]  }
   0x1 LB: > { %s479_s22 = sadd.s32 4294967295, %s537_s21   ;;  %p483_p0 = scmp.ge.s32.totalorder %s537_s21, 1  ;;  %s537_s21 = sphi %s575_s21, %s16_s21  }
   0x2   : > { %p220_p1 = scmp.lt.s32.totalorder %s537_s21, 3 }
   0x4   : > { %p221_p2 = pnand %p483_p0, %p220_p1 }
   0x5   : > { %p252_p3 = scmp.lt.s32.totalorder (!%p221_p2), %s479_s22, 1 }
   0x6   : > { %224 = sbr.rel (%p221_p2) target bundleno = 576 (0x240), region = 44 }
   0xb   : > { %v510_v0 = vld [vmem:[%s624_s3 + $0x8] sm:$0xff]  ;;  %v509_v1 = vld [vmem:[%s624_s3] sm:$0xff]  ;;  %s629_s22 = smov (!%p252_p3, %s479_s22), 1  ;;  %vm288_vm0 = vcmask 261120   ;;  %v539_v13 = vmov 0   ;;  %vm341_vm2 = vcmask 7168  }
   0xc   : > { %298 = vmatpush.bf16.msra.mxu0 %v510_v0  ;;  %s589_s27 = sshll.u32 %s629_s22, 3  ;;  %v512_v4 = vld [vmem:[%s626_s5 + $0x8] sm:$0xff]  ;;  %v511_v5 = vld [vmem:[%s626_s5] sm:$0xff]  ;;  %522 = vset.pattern.permute.xlu0 %v539_v13  ;;  %vm365_vm3 = vcmask 1043456   ;;  %vm361_vm4 = vcmask 64512  }
   0xd   : > { %s255_s30 = scalar_lea.vmem %s621_s0, %s589_s27  ;;  %332 = vmatpush.bf16.msra.mxu1 %v512_v4  ;;  %v524_v6 = vld [vmem:[%s625_s4] ss:$0 sm:$0xff]  ;;  %s259_s15 = scalar_lea.vmem %s622_s1, %s589_s27  ;;  %523 = vset.pattern.permute.xlu1 %v539_v13 }
   0xe   : > { %v265_v2 = vld [vmem:[%s255_s30] sm:$0xff]  ;;  %s263_s20 = scalar_lea.vmem %s627_s6, %s589_s27 }
   0xf   : > { %v267_v3 = vpack.c.bf16 %v265_v2, %v265_v2  ;;  %v266_v12 = vld [vmem:[%s259_s15] sm:$0xff] }
  0x10   : > { %299 = vmatpush.bf16.msra.mxu0 %v509_v1  ;;  %409 = vperm.xlu1 %523, %v266_v12   ;;  %vm339_vm1 = vcmp.gt.f32.partialorder %v266_v12, 0.5  ;;  %v353_v30 = vld [vmem:[%s623_s2] sm:$0xf] }
  0x11   : > { %333 = vmatpush.bf16.msra.mxu1 %v511_v5 }
  0x13   : > { %495 = vmatmul.msk.bf16.vlgmr.msra.gmra.mxu0 %vm288_vm0, %v267_v3 }
  0x82   : > { %v410_v41 = vpop.permute.xlu1 %409 }
  0x90   : > { %v301_v7 = vpop.f32.mrf.mxu0 }
  0x91   : > { %v302_v8 = vadd.f32 %v524_v6, %v301_v7 }
  0x93   : > { %525 = vtanh.f32 %v302_v8 }
  0x98   : > { %v303_v9 = vpop.f32.mrf.mxu0 }
  0x99   : > { %v526_v10 = vpop.eup %525 }
  0x9a   : > { %v306_v11 = vpack.c.bf16 %v526_v10, %v526_v10 }
  0x9c   : > { %504 = vmatmul.msk.bf16.vlgmr.msra.gmra.mxu1 %vm288_vm0, %v306_v11 }
 0x119   : > { %v335_v14 = vpop.f32.mrf.mxu1 }
 0x11a   : > { %v340_v15 = vsel %vm339_vm1, %v335_v14, -1e+30 }
 0x11b   : > { %v342_v16 = vsel %vm341_vm2, %v340_v15, -inf }
 0x11c   : > { %v343_v17 = vrot.slane %v342_v16, 4 }
 0x11e   : > { %v344_v18 = vmax.f32 %v342_v16, %v343_v17 }
 0x120   : > { %v345_v19 = vrot.slane %v344_v18, 2 }
 0x121   : > { %v337_v20 = vpop.f32.mrf.mxu1 }
 0x122   : > { %v346_v21 = vmax.f32 %v344_v18, %v345_v19 }
 0x124   : > { %v347_v22 = vrot.slane %v346_v21, 1 }
 0x126   : > { %v348_v23 = vmax.f32 %v346_v21, %v347_v22 }
 0x128   : > { %v349_v24 = vsub.f32 %v340_v15, %v348_v23 }
 0x12a   : > { %v350_v25 = vmul.f32 1.442695, %v349_v24 }
 0x12c   : > { %527 = vpow2.f32 %v350_v25 }
 0x132   : > { %v528_v26 = vpop.eup %527 }
 0x133   : > { %v352_v27 = vmul.f32 %v528_v26, %v266_v12 }
 0x135   : > { %356 = vperm.xlu0 %522, %v352_v27   ;;  %v382_v28 = vpack.c.bf16 %v352_v27, %v352_v27 }
 0x137   : > { %v384_v29 = vsel %vm365_vm3, %v382_v28, 0 }
 0x138   : > { %393 = vmatpush.bf16.msra.mxu3 %v384_v29 }
 0x13b   : > { %506 = vmatmul.msk.bf16.vlgmr.msra.gmra.mxu3 %vm361_vm4, %v353_v30 }
 0x1a7   : > { %v357_v31 = vpop.permute.xlu0 %356 }
 0x1a8   : > { %v359_v32 = vmul.f32 %v357_v31, %v265_v2 }
 0x1aa   : > { %v360_v33 = vpack.c.bf16 %v359_v32, %v359_v32 }
 0x1ac   : > { %v367_v34 = vsel %vm365_vm3, %v360_v33, 0 }
 0x1ad   : > { %376 = vmatpush.bf16.msra.mxu2 %v367_v34 }
 0x1b0   : > { %505 = vmatmul.msk.bf16.vlgmr.msra.gmra.mxu2 %vm361_vm4, %v353_v30 }
 0x1be   : > { %v395_v35 = vpop.f32.mrf.mxu3 }
 0x1bf   : > { %v399_v36 = vmax.f32 %v395_v35, 1e-30 }
 0x1c1   : > { %529 = vrcp.f32 %v399_v36 }
 0x1c6   : > { %v397_v37 = vpop.f32.mrf.mxu3 }
 0x1c7   : > { %v530_v38 = vpop.eup %529 }
 0x1c8   : > { %403 = vperm.xlu0 %522, %v530_v38  }
 0x233   : > { %v378_v39 = vpop.f32.mrf.mxu2 }
 0x23a   : > { %v404_v40 = vpop.permute.xlu0 %403 }
 0x23b   : > { %v406_v42 = vmul.f32 %v404_v40, %v378_v39  ;;  %v380_v43 = vpop.f32.mrf.mxu2 }
 0x23d   : > { %v412_v44 = vmul.f32 %v410_v41, %v406_v42 }
 0x23f   : > { %413 = vst.msk [vmem:[%s263_s20] sm:$0xff] %vm288_vm0, %v412_v44 }
 0x240 PF: > { %s16_s21 = sadd.s32 1, %s537_s21  }
 0x241   : > { %p13_p4 = scmp.ge.s32.totalorder %s16_s21, 4  }
 0x243   :  { %15 = sbr.rel (!%p13_p4) target bundleno = 1 (0x1), region = 77 }

// kernel: hram_forward.3
= control target key start
LH: loop header
LB: loop body
LE: loop exit
PB: predicated region body
PF: predicated region fallthrough
CT: control target
= control target key end

     0   :  { %s1906_s20 = smov 0   ;;  %s2187_s0 = inlined_call_operand.vmem [shape: f32[64,8], index: 0, kind: input, shape index: {}]   ;;  %s2188_s1 = inlined_call_operand.vmem [shape: f32[64,32], index: 1, kind: input, shape index: {}]   ;;  %s2189_s2 = inlined_call_operand.vmem [shape: f32[16,32], index: 2, kind: input, shape index: {}]   ;;  %s2190_s3 = inlined_call_operand.vmem [shape: bf16[32,8], index: 3, kind: input, shape index: {}]   ;;  %s2191_s4 = inlined_call_operand.vmem [shape: bf16[8,128], index: 4, kind: input, shape index: {}]   ;;  %s2192_s5 = inlined_call_operand.vmem [shape: f32[1,128], index: 5, kind: input, shape index: {}]   ;;  %s2193_s6 = inlined_call_operand.vmem [shape: bf16[128,64], index: 6, kind: input, shape index: {}]   ;;  %s2194_s7 = inlined_call_operand.vmem [shape: f32[1,64], index: 7, kind: input, shape index: {}]   ;;  %s2195_s8 = inlined_call_operand.vmem [shape: bf16[32,64], index: 8, kind: input, shape index: {}]   ;;  %s2196_s9 = inlined_call_operand.vmem [shape: f32[1,64], index: 9, kind: input, shape index: {}]   ;;  %s2197_s10 = inlined_call_operand.vmem [shape: bf16[64,256], index: 10, kind: input, shape index: {}]   ;;  %s2198_s11 = inlined_call_operand.vmem [shape: bf16[64,256], index: 11, kind: input, shape index: {}]   ;;  %s2199_s12 = inlined_call_operand.vmem [shape: f32[1,256], index: 12, kind: input, shape index: {}]   ;;  %s2200_s13 = inlined_call_operand.vmem [shape: bf16[256,128], index: 13, kind: input, shape index: {}]   ;;  %s2201_s14 = inlined_call_operand.vmem [shape: f32[1,128], index: 14, kind: input, shape index: {}]   ;;  %s2202_s15 = inlined_call_operand.vmem [shape: bf16[128,64], index: 15, kind: input, shape index: {}]   ;;  %s2203_s16 = inlined_call_operand.vmem [shape: f32[1,64], index: 16, kind: input, shape index: {}]   ;;  %s2204_s17 = inlined_call_operand.vmem [shape: bf16[1,64], index: 17, kind: input, shape index: {}]   ;;  %s2205_s18 = inlined_call_operand.<no memory space> [shape: f32[1,1], index: 18, kind: input, shape index: {}]   ;;  %s2206_s19 = inlined_call_operand.vmem [shape: f32[2,1,32], index: 19, kind: output, shape index: {}]  }
   0x1   :  { %2208 = sst [smem:[#allocation3_spill]] %s2187_s0  ;;  %v24_v0 = vstv %s2205_s18 }
   0x2   :  { %2209 = sst [smem:[#allocation4_spill]] %s2188_s1  ;;  %25 = vst [vmem:[#allocation2] sm:$0x1] %v24_v0 }
   0x3   :  { %2210 = sst [smem:[#allocation5_spill]] %s2189_s2 }
   0x4   :  { %2211 = sst [smem:[#allocation6_spill]] %s2190_s3 }
   0x5 LB: > { %s1487_s21 = sadd.s32 4294967295, %s1800_s20   ;;  %p1491_p0 = scmp.ge.s32.totalorder %s1800_s20, 1  ;;  %s1800_s20 = sphi %s1906_s20, %s31_s20  }
   0x6   : > { %p560_p1 = scmp.lt.s32.totalorder %s1800_s20, 3 }
   0x8   : > { %p561_p2 = pnand %p1491_p0, %p560_p1 }
   0x9   : > { %p635_p3 = scmp.lt.s32.totalorder (!%p561_p2), %s1487_s21, 1  ;;  %s1492_s18 = sshll.u32 (!%p561_p2), %s1487_s21, 2 }
   0xa   : > { %564 = sbr.rel (%p561_p2) target bundleno = 939 (0x3ab), region = 96  ;;  %p624_p4 = scmp.lt.s32.totalorder (!%p561_p2), %s1492_s18, 7 }
   0xb   : > { %s2212_s28 = sld [smem:[#allocation5_spill]] (!%p561_p2) }
   0xc   : > { %s2213_s22 = sld [smem:[#allocation3_spill]] (!%p561_p2) }
   0xd   : > { %s2214_s26 = sld [smem:[#allocation6_spill]] (!%p561_p2) }
   0xe   : > { %s2215_s23 = sld [smem:[#allocation4_spill]] (!%p561_p2) }
   0xf   : > { %vm666_vm0 = vcmask 1043456   ;;  %v703_v1 = vld [vmem:[%s2191_s4] sm:$0xf]  ;;  %v1732_v3 = vld [vmem:[%s2193_s6 + $0x38] sm:$0xff]  ;;  %s2217_s21 = smov (!%p635_p3, %s1487_s21), 1  ;;  %s2219_s18 = smov (!%p624_p4, %s1492_s18), 7 }
  0x10   : > { %v715_v2 = vsel %vm666_vm0, %v703_v1, 0  ;;  %810 = vmatpush.bf16.msra.mxu2 %v1732_v3  ;;  %v1731_v4 = vld [vmem:[%s2193_s6 + $0x30] sm:$0xff]  ;;  %s1496_s3 = sshll.u32 %s2217_s21, 3  ;;  %s1493_s0 = sshll.u32 %s2219_s18, 3  ;;  %vm659_vm1 = vcmask 64512   ;;  %v1730_v9 = vld [vmem:[%s2193_s6 + $0x28] sm:$0xff] }
  0x11   : > { %724 = vmatpush.bf16.msra.mxu1 %v715_v2  ;;  %s638_s29 = scalar_lea.vmem %s2212_s28, %s1496_s3  ;;  %v1729_v13 = vld [vmem:[%s2193_s6 + $0x20] sm:$0xff]  ;;  %v1728_v18 = vld [vmem:[%s2193_s6 + $0x18] sm:$0xff]  ;;  %v1727_v19 = vld [vmem:[%s2193_s6 + $0x10] sm:$0xff]  ;;  %vm855_vm2 = vcmask 261120   ;;  %vm941_vm3 = vcmask 523264   ;;  %vm1414_vm7 = vcmask 253952  }
  0x12   : > { %v647_v5 = vld [vmem:[%s638_s29] sm:$0xff]  ;;  %s627_s2 = scalar_lea.vmem %s2213_s22, %s1493_s0  ;;  %v1726_v20 = vld [vmem:[%s2193_s6 + $0x8] sm:$0xff]  ;;  %v1577_v25 = vld [vmem:[%s2198_s11 + $0x30] sm:$0xf] }
  0x13   : > { %v648_v6 = vpack.c.bf16 %v647_v5, %v647_v5  ;;  %v697_v7 = vld [vmem:[%s627_s2] sm:$0xff]  ;;  %v698_v8 = vld [vmem:[%s627_s2 + $0x8] sm:$0xff]  ;;  %v699_v14 = vld [vmem:[%s627_s2 + $0x10] sm:$0xff] }
  0x14   : > { %811 = vmatpush.bf16.msra.mxu2 %v1731_v4  ;;  %v701_v10 = vpack.c.bf16 %v698_v8, %v697_v7  ;;  %v1723_v12 = vld [vmem:[%s2214_s26] sm:$0xff]  ;;  %v700_v15 = vld [vmem:[%s627_s2 + $0x18] sm:$0xff]  ;;  %v1724_v17 = vld [vmem:[%s2214_s26 + $0x8] sm:$0xff]  ;;  %s633_s24 = scalar_lea.vmem %s2215_s23, %s1493_s0  ;;  %s641_s0 = scalar_lea.vmem %s2206_s19, %s2217_s21 }
  0x15   : > { %v668_v11 = vsel %vm666_vm0, %v648_v6, 0  ;;  %v702_v16 = vpack.c.bf16 %v700_v15, %v699_v14  ;;  %v1734_v21 = vld [vmem:[%s2195_s8 + $0x8] sm:$0xff]  ;;  %v1725_v22 = vld [vmem:[%s2193_s6] sm:$0xff]  ;;  %v1750_v26 = vld [vmem:[%s2198_s11 + $0x34] sm:$0xf0] }
  0x16   : > { %677 = vmatpush.bf16.msra.mxu0 %v668_v11  ;;  %1507 = vmatmul.msk.bf16.vlgmr.msra.gmra.mxu1 %vm659_vm1, %v701_v10  ;;  %v1733_v23 = vld [vmem:[%s2195_s8] sm:$0xff]  ;;  %v1749_v27 = vld [vmem:[%s2198_s11 + $0x34] sm:$0xf]  ;;  %v1578_v28 = vor.u32 %v1750_v26, %v1577_v25  ;;  %v1579_v29 = vld [vmem:[%s2198_s11 + $0x38] sm:$0xf0] }
  0x17   : > { %868 = vmatpush.bf16.msra.mxu3 %v1734_v21  ;;  %v1582_v30 = vor.u32 %v1749_v27, %v1579_v29  ;;  %v1785_v31 = vld [vmem:[%s2192_s5] ss:$0 sm:$0xff]  ;;  %v690_v37 = vld [vmem:[%s633_s24 + $0x8] sm:$0xff]  ;;  %v691_v48 = vld [vmem:[%s633_s24 + $0x10] sm:$0xff] }
  0x18   : > { %812 = vmatpush.bf16.msra.mxu2 %v1730_v9  ;;  %v689_v34 = vld [vmem:[%s633_s24] sm:$0xff]  ;;  %v692_v51 = vld [vmem:[%s633_s24 + $0x18] sm:$0xff]  ;;  %v1613_v59 = vld [vmem:[%s2197_s10 + $0x30] sm:$0xf] }
  0x19   : > { %1505 = vmatmul.msk.bf16.vlgmr.msra.gmra.mxu0 %vm659_vm1, %v1723_v12  ;;  %971 = vmatpush.bf16.msrb.mxu1 %v1582_v30  ;;  %v1742_v60 = vld [vmem:[%s2197_s10 + $0x34] sm:$0xf0]  ;;  %v1741_v61 = vld [vmem:[%s2197_s10 + $0x34] sm:$0xf]  ;;  %v1615_v63 = vld [vmem:[%s2197_s10 + $0x38] sm:$0xf0] }
  0x1a   : > { %952 = vmatpush.bf16.msrb.mxu0 %v1578_v28  ;;  %v1614_v62 = vor.u32 %v1742_v60, %v1613_v59  ;;  %v1618_v0 = vor.u32 %v1741_v61, %v1615_v63  ;;  %v1569_v1 = vld [vmem:[%s2198_s11 + $0x20] sm:$0xf]  ;;  %v1748_v2 = vld [vmem:[%s2198_s11 + $0x24] sm:$0xf0]  ;;  %v1747_v4 = vld [vmem:[%s2198_s11 + $0x24] sm:$0xf] }
  0x1b   : > { %869 = vmatpush.bf16.msra.mxu3 %v1733_v23  ;;  %v1570_v3 = vor.u32 %v1748_v2, %v1569_v1  ;;  %v1571_v5 = vld [vmem:[%s2198_s11 + $0x28] sm:$0xf0]  ;;  %v1605_v6 = vld [vmem:[%s2197_s10 + $0x20] sm:$0xf]  ;;  %v1740_v8 = vld [vmem:[%s2197_s10 + $0x24] sm:$0xf0] }
  0x1c   : > { %813 = vmatpush.bf16.msra.mxu2 %v1729_v13  ;;  %v1574_v7 = vor.u32 %v1747_v4, %v1571_v5  ;;  %v1739_v9 = vld [vmem:[%s2197_s10 + $0x24] sm:$0xf]  ;;  %v1607_v10 = vld [vmem:[%s2197_s10 + $0x28] sm:$0xf0]  ;;  %v1606_v11 = vor.u32 %v1740_v8, %v1605_v6  ;;  %v1561_v13 = vld [vmem:[%s2198_s11 + $0x10] sm:$0xf] }
  0x1d   : > { %v1610_v12 = vor.u32 %v1739_v9, %v1607_v10  ;;  %v1746_v14 = vld [vmem:[%s2198_s11 + $0x14] sm:$0xf0]  ;;  %v1745_v15 = vld [vmem:[%s2198_s11 + $0x14] sm:$0xf]  ;;  %v1599_v23 = vld [vmem:[%s2197_s10 + $0x18] sm:$0xf0] }
  0x1e   : > { %953 = vmatpush.bf16.msrb.mxu0 %v1570_v3  ;;  %972 = vmatpush.bf16.msrb.mxu1 %v1574_v7  ;;  %v1737_v21 = vld [vmem:[%s2197_s10 + $0x14] sm:$0xf]  ;;  %v1553_v25 = vld [vmem:[%s2198_s11] sm:$0xf]  ;;  %v1744_v26 = vld [vmem:[%s2198_s11 + $0x4] sm:$0xf0] }
  0x1f   : > { %1036 = vmatpush.bf16.msrb.mxu3 %v1614_v62  ;;  %v1743_v27 = vld [vmem:[%s2198_s11 + $0x4] sm:$0xf]  ;;  %v1554_v28 = vor.u32 %v1744_v26, %v1553_v25  ;;  %v1555_v29 = vld [vmem:[%s2198_s11 + $0x8] sm:$0xf0]  ;;  %v1589_v30 = vld [vmem:[%s2197_s10] sm:$0xf] }
  0x20   : > { %814 = vmatpush.bf16.msra.mxu2 %v1728_v18  ;;  %v1756_v3 = vld [vmem:[%s2200_s13 + $0x28] sm:$0xff]  ;;  %v1755_v5 = vld [vmem:[%s2200_s13 + $0x20] sm:$0xff]  ;;  %v1754_v7 = vld [vmem:[%s2200_s13 + $0x18] sm:$0xff] }
  0x21   : > { %v1764_v4 = vld [vmem:[%s2200_s13 + $0x68] sm:$0xff]  ;;  %v1763_v6 = vld [vmem:[%s2200_s13 + $0x60] sm:$0xff]  ;;  %v1762_v8 = vld [vmem:[%s2200_s13 + $0x58] sm:$0xff] }
  0x22   : > { %v1753_v9 = vld [vmem:[%s2200_s13 + $0x10] sm:$0xff] }
  0x23   : > { %1037 = vmatpush.bf16.msrb.mxu3 %v1606_v11  ;;  %v1761_v10 = vld [vmem:[%s2200_s13 + $0x50] sm:$0xff]  ;;  %v1752_v11 = vld [vmem:[%s2200_s13 + $0x8] sm:$0xff] }
  0x24   : > { %815 = vmatpush.bf16.msra.mxu2 %v1727_v19  ;;  %v1597_v19 = vld [vmem:[%s2197_s10 + $0x10] sm:$0xf] }
  0x26   : > { %1508 = vmatmul.msk.bf16.gmra.mxu1 %vm659_vm1, %v702_v16  ;;  %v1562_v16 = vor.u32 %v1746_v14, %v1561_v13  ;;  %v1751_v13 = vld [vmem:[%s2200_s13] sm:$0xff] }
  0x27   : > { %v1759_v14 = vld [vmem:[%s2200_s13 + $0x40] sm:$0xff] }
  0x28   : > { %816 = vmatpush.bf16.msra.mxu2 %v1726_v20  ;;  %v1738_v20 = vld [vmem:[%s2197_s10 + $0x14] sm:$0xf0]  ;;  %954 = vmatpush.bf16.msrb.mxu0 %v1562_v16 }
  0x29   : > { %1506 = vmatmul.msk.bf16.gmra.mxu0 %vm659_vm1, %v1724_v17  ;;  %v1563_v17 = vld [vmem:[%s2198_s11 + $0x18] sm:$0xf0] }
  0x2a   : > { %v1566_v18 = vor.u32 %v1745_v15, %v1563_v17 }
  0x2c   : > { %817 = vmatpush.bf16.msra.mxu2 %v1725_v22  ;;  %v1598_v22 = vor.u32 %v1738_v20, %v1597_v19  ;;  %973 = vmatpush.bf16.msrb.mxu1 %v1566_v18  ;;  %v1774_v19 = vld [vmem:[%s2202_s15 + $0x38] sm:$0xff]  ;;  %v1070_v20 = vld [vmem:[%s2199_s12] sm:$0x3] }
  0x2d   : > { %955 = vmatpush.bf16.msrb.mxu0 %v1554_v28  ;;  %v1072_v25 = vperm.slane %v1070_v20, 0  ;;  %v1772_v28 = vld [vmem:[%s2202_s15 + $0x28] sm:$0xff] }
  0x2e   : > { %1038 = vmatpush.bf16.msrb.mxu3 %v1598_v22 }
  0x30   : > { %1055 = vmatpush.bf16.msrb.mxu2 %v1618_v0 }
  0x34   : > { %1056 = vmatpush.bf16.msrb.mxu2 %v1610_v12  ;;  %v1760_v12 = vld [vmem:[%s2200_s13 + $0x48] sm:$0xff] }
  0x93   : > { %v726_v24 = vpop.f32.mrf.mxu1 }
  0x94   : > { %v727_v33 = vadd.f32 %v1785_v31, %v726_v24  ;;  %v1602_v24 = vor.u32 %v1737_v21, %v1599_v23  ;;  %v1773_v23 = vld [vmem:[%s2202_s15 + $0x30] sm:$0xff] }
  0x96   : > { %v679_v32 = vpop.f32.mrf.mxu0  ;;  %v736_v39 = vmax.f32 %v727_v33, 0.0  ;;  %1057 = vmatpush.bf16.msrb.mxu2 %v1602_v24 }
  0x97   : > { %v693_v38 = vmul.f32 %v689_v34, %v679_v32  ;;  %v1558_v32 = vor.u32 %v1743_v27, %v1555_v29  ;;  %v1735_v34 = vld [vmem:[%s2197_s10 + $0x4] sm:$0xf]  ;;  %v1073_v27 = vperm.slane %v1070_v20, 1 }
  0x99   : > { %974 = vmatpush.bf16.msrb.mxu1 %v1558_v32 }
  0x9b   : > { %v728_v35 = vpop.f32.mrf.mxu1 }
  0x9c   : > { %v729_v36 = vadd.f32 %v1785_v31, %v728_v35  ;;  %v1591_v35 = vld [vmem:[%s2197_s10 + $0x8] sm:$0xf0] }
  0x9e   : > { %v737_v40 = vmax.f32 %v729_v36, 0.0  ;;  %v681_v41 = vpop.f32.mrf.mxu0  ;;  %v1594_v36 = vor.u32 %v1735_v34, %v1591_v35 }
  0x9f   : > { %v694_v42 = vmul.f32 %v690_v37, %v681_v41  ;;  %v1758_v37 = vld [vmem:[%s2200_s13 + $0x38] sm:$0xff]  ;;  %v1757_v41 = vld [vmem:[%s2200_s13 + $0x30] sm:$0xff] }
  0xa0   : > { %v740_v43 = vpack.c.bf16 %v737_v40, %v736_v39  ;;  %1058 = vmatpush.bf16.msrb.mxu2 %v1594_v36  ;;  %1228 = vmatpush.bf16.msra.mxu0 %v1758_v37  ;;  %v1771_v37 = vld [vmem:[%s2202_s15 + $0x20] sm:$0xff] }
  0xa1   : > { %v833_v44 = vpack.c.bf16 %v694_v42, %v693_v38  ;;  %v1766_v38 = vld [vmem:[%s2200_s13 + $0x78] sm:$0xff]  ;;  %v1765_v42 = vld [vmem:[%s2200_s13 + $0x70] sm:$0xff] }
  0xa2   : > { %818 = vmatmul.bf16.vlgmr.msra.gmra.mxu2 %v740_v43  ;;  %1247 = vmatpush.bf16.msra.mxu1 %v1766_v38  ;;  %v1786_v43 = vld [vmem:[%s2194_s7] ss:$0 sm:$0xff] }
  0xa3   : > { %v731_v45 = vpop.f32.mrf.mxu1  ;;  %1549 = vmatmul.msk.bf16.vlgmr.msra.gmra.mxu3 %vm855_vm2, %v833_v44  ;;  %v1787_v44 = vld [vmem:[%s2196_s9] ss:$0 sm:$0xff] }
  0xa4   : > { %v732_v47 = vadd.f32 %v1785_v31, %v731_v45  ;;  %1229 = vmatpush.bf16.msra.mxu0 %v1757_v41 }
  0xa6   : > { %v684_v46 = vpop.f32.mrf.mxu0  ;;  %v738_v53 = vmax.f32 %v732_v47, 0.0  ;;  %1248 = vmatpush.bf16.msra.mxu1 %v1765_v42 }
  0xa7   : > { %v695_v52 = vmul.f32 %v691_v48, %v684_v46 }
  0xa8   : > { %1230 = vmatpush.bf16.msra.mxu0 %v1756_v3  ;;  %v1769_v3 = vld [vmem:[%s2202_s15 + $0x10] sm:$0xff] }
  0xaa   : > { %1249 = vmatpush.bf16.msra.mxu1 %v1764_v4  ;;  %v1768_v4 = vld [vmem:[%s2202_s15 + $0x8] sm:$0xff] }
  0xab   : > { %v733_v49 = vpop.f32.mrf.mxu1 }
  0xac   : > { %v734_v50 = vadd.f32 %v1785_v31, %v733_v49  ;;  %v1736_v31 = vld [vmem:[%s2197_s10 + $0x4] sm:$0xf0]  ;;  %1231 = vmatpush.bf16.msra.mxu0 %v1755_v5  ;;  %v1767_v5 = vld [vmem:[%s2202_s15] sm:$0xff] }
  0xad   : > { %v1590_v33 = vor.u32 %v1736_v31, %v1589_v30 }
  0xae   : > { %v739_v54 = vmax.f32 %v734_v50, 0.0  ;;  %v686_v55 = vpop.f32.mrf.mxu0  ;;  %1250 = vmatpush.bf16.msra.mxu1 %v1763_v6 }
  0xaf   : > { %v696_v56 = vmul.f32 %v692_v51, %v686_v55  ;;  %1039 = vmatpush.bf16.msrb.mxu3 %v1590_v33 }
  0xb0   : > { %v741_v57 = vpack.c.bf16 %v739_v54, %v738_v53  ;;  %1232 = vmatpush.bf16.msra.mxu0 %v1754_v7 }
  0xb1   : > { %v834_v58 = vpack.c.bf16 %v696_v56, %v695_v52 }
  0xb2   : > { %823 = vmatmul.bf16.gmra.mxu2 %v741_v57  ;;  %1251 = vmatpush.bf16.msra.mxu1 %v1762_v8  ;;  %v1788_v8 = vld [vmem:[%s2201_s14] ss:$0 sm:$0xff] }
  0xb3   : > { %1550 = vmatmul.msk.bf16.gmra.mxu3 %vm855_vm2, %v834_v58 }
  0xb4   : > { %1233 = vmatpush.bf16.msra.mxu0 %v1753_v9  ;;  %1340 = vmatpush.bf16.msra.mxu3 %v1774_v19 }
  0xb6   : > { %1252 = vmatpush.bf16.msra.mxu1 %v1761_v10 }
  0xb8   : > { %1234 = vmatpush.bf16.msra.mxu0 %v1752_v11  ;;  %1341 = vmatpush.bf16.msra.mxu3 %v1773_v23 }
  0xba   : > { %1253 = vmatpush.bf16.msra.mxu1 %v1760_v12 }
  0xbc   : > { %1235 = vmatpush.bf16.msra.mxu0 %v1751_v13  ;;  %1342 = vmatpush.bf16.msra.mxu3 %v1772_v28 }
  0xbe   : > { %1254 = vmatpush.bf16.msra.mxu1 %v1759_v14 }
  0xc0   : > { %1343 = vmatpush.bf16.msra.mxu3 %v1771_v37 }
 0x125   : > { %v819_v39 = vpop.f32.mrf.mxu2 }
 0x126   : > { %v871_v40 = vpop.f32.mrf.mxu3  ;;  %v820_v45 = vadd.f32 %v1786_v43, %v819_v39 }
 0x127   : > { %v872_v49 = vadd.f32 %v1787_v44, %v871_v40 }
 0x128   : > { %v829_v51 = vmax.f32 %v820_v45, 0.0 }
 0x12d   : > { %v821_v46 = vpop.f32.mrf.mxu2 }
 0x12e   : > { %v822_v47 = vadd.f32 %v1786_v43, %v821_v46  ;;  %v873_v48 = vpop.f32.mrf.mxu3 }
 0x12f   : > { %v874_v50 = vadd.f32 %v1787_v44, %v873_v48 }
 0x130   : > { %v830_v52 = vmax.f32 %v822_v47, 0.0 }
 0x131   : > { %v891_v53 = vpack.c.bf16 %v874_v50, %v872_v49 }
 0x132   : > { %v881_v54 = vpack.c.bf16 %v830_v52, %v829_v51 }
 0x133   : > { %1583 = vmatmul.msk.bf16.vlgmr.msrb.gmra.mxu0 %vm941_vm3, %v891_v53  ;;  %1585 = vmatmul.msk.bf16.vlgmr.msrb.gmra.mxu1 %vm941_vm3, %v891_v53 }
 0x134   : > { %1619 = vmatmul.msk.bf16.vlgmr.msrb.gmra.mxu3 %vm941_vm3, %v881_v54  ;;  %1621 = vmatmul.msk.bf16.vlgmr.msrb.gmra.mxu2 %vm941_vm3, %v881_v54 }
 0x135   : > { %v824_v55 = vpop.f32.mrf.mxu2 }
 0x136   : > { %v876_v56 = vpop.f32.mrf.mxu3  ;;  %v825_v57 = vadd.f32 %v1786_v43, %v824_v55 }
 0x137   : > { %v877_v61 = vadd.f32 %v1787_v44, %v876_v56 }
 0x138   : > { %v831_v63 = vmax.f32 %v825_v57, 0.0 }
 0x13d   : > { %v826_v58 = vpop.f32.mrf.mxu2 }
 0x13e   : > { %v827_v59 = vadd.f32 %v1786_v43, %v826_v58  ;;  %v878_v60 = vpop.f32.mrf.mxu3 }
 0x13f   : > { %v879_v62 = vadd.f32 %v1787_v44, %v878_v60 }
 0x140   : > { %v832_v0 = vmax.f32 %v827_v59, 0.0 }
 0x141   : > { %v892_v1 = vpack.c.bf16 %v879_v62, %v877_v61 }
 0x142   : > { %v882_v2 = vpack.c.bf16 %v832_v0, %v831_v63 }
 0x143   : > { %1584 = vmatmul.msk.bf16.gmra.mxu0 %vm941_vm3, %v892_v1  ;;  %1586 = vmatmul.msk.bf16.gmra.mxu1 %vm941_vm3, %v892_v1 }
 0x144   : > { %1620 = vmatmul.msk.bf16.gmra.mxu3 %vm941_vm3, %v882_v2  ;;  %1622 = vmatmul.msk.bf16.gmra.mxu2 %vm941_vm3, %v882_v2  ;;  %v1770_v2 = vld [vmem:[%s2202_s15 + $0x18] sm:$0xff] }
 0x145   : > { %1344 = vmatpush.bf16.msra.mxu3 %v1770_v2 }
 0x149   : > { %1345 = vmatpush.bf16.msra.mxu3 %v1769_v3 }
 0x14d   : > { %1346 = vmatpush.bf16.msra.mxu3 %v1768_v4 }
 0x151   : > { %1347 = vmatpush.bf16.msra.mxu3 %v1767_v5 }
 0x1b0   : > { %v957_v15 = vpop.f32.mrf.mxu0  ;;  %v976_v16 = vpop.f32.mrf.mxu1 }
 0x1b7   : > { %v1041_v17 = vpop.f32.mrf.mxu3  ;;  %v1060_v18 = vpop.f32.mrf.mxu2 }
 0x1b8   : > { %v959_v21 = vpop.f32.mrf.mxu0  ;;  %v978_v22 = vpop.f32.mrf.mxu1  ;;  %v1042_v24 = vadd.f32 %v1041_v17, %v957_v15  ;;  %v1061_v26 = vadd.f32 %v1060_v18, %v976_v16 }
 0x1ba   : > { %v1076_v31 = vadd.f32 %v1072_v25, %v1042_v24  ;;  %v1077_v32 = vadd.f32 %v1073_v27, %v1061_v26 }
 0x1bc   : > { %v1084_v38 = vmax.f32 %v1076_v31, 0.0  ;;  %v1085_v39 = vmax.f32 %v1077_v32, 0.0  ;;  %v1366_v31 = vld [vmem:[#allocation2] sm:$0x1] }
 0x1bf   : > { %v1043_v29 = vpop.f32.mrf.mxu3  ;;  %v1062_v30 = vpop.f32.mrf.mxu2 }
 0x1c0   : > { %v1044_v33 = vadd.f32 %v1043_v29, %v959_v21  ;;  %v1063_v34 = vadd.f32 %v1062_v30, %v978_v22  ;;  %v962_v42 = vpop.f32.mrf.mxu0  ;;  %v981_v43 = vpop.f32.mrf.mxu1 }
 0x1c2   : > { %v1078_v35 = vadd.f32 %v1072_v25, %v1044_v33  ;;  %v1079_v36 = vadd.f32 %v1073_v27, %v1063_v34  ;;  %v1802_v33 = vmov 0   ;;  %v1789_v34 = vld [vmem:[%s2203_s16] ss:$0 sm:$0xff] }
 0x1c3   : > { %1784 = vset.pattern.permute.xlu0 %v1802_v33 }
 0x1c4   : > { %v1086_v40 = vmax.f32 %v1078_v35, 0.0  ;;  %v1087_v41 = vmax.f32 %v1079_v36, 0.0  ;;  %1369 = vperm.xlu0 %1784, %v1366_v31  }
 0x1c6   : > { %v1092_v44 = vpack.c.bf16 %v1086_v40, %v1084_v38  ;;  %v1093_v45 = vpack.c.bf16 %v1087_v41, %v1085_v39 }
 0x1c7   : > { %v1046_v46 = vpop.f32.mrf.mxu3  ;;  %v1065_v47 = vpop.f32.mrf.mxu2 }
 0x1c8   : > { %1236 = vmatmul.bf16.vlgmr.msra.gmra.mxu0 %v1092_v44  ;;  %1255 = vmatmul.bf16.vlgmr.msra.gmra.mxu1 %v1093_v45  ;;  %v1047_v48 = vadd.f32 %v1046_v46, %v962_v42  ;;  %v1066_v49 = vadd.f32 %v1065_v47, %v981_v43  ;;  %v964_v50 = vpop.f32.mrf.mxu0  ;;  %v983_v51 = vpop.f32.mrf.mxu1 }
 0x1ca   : > { %v1080_v54 = vadd.f32 %v1072_v25, %v1047_v48  ;;  %v1081_v55 = vadd.f32 %v1073_v27, %v1066_v49  ;;  %v1363_v48 = vld [vmem:[%s2204_s17] sm:$0x1] }
 0x1cc   : > { %v1088_v60 = vmax.f32 %v1080_v54, 0.0  ;;  %v1089_v61 = vmax.f32 %v1081_v55, 0.0 }
 0x1cf   : > { %v1048_v52 = vpop.f32.mrf.mxu3  ;;  %v1067_v53 = vpop.f32.mrf.mxu2 }
 0x1d0   : > { %v1049_v56 = vadd.f32 %v1048_v52, %v964_v50  ;;  %v1068_v57 = vadd.f32 %v1067_v53, %v983_v51 }
 0x1d2   : > { %v1082_v58 = vadd.f32 %v1072_v25, %v1049_v56  ;;  %v1083_v59 = vadd.f32 %v1073_v27, %v1068_v57 }
 0x1d4   : > { %v1090_v62 = vmax.f32 %v1082_v58, 0.0  ;;  %v1091_v63 = vmax.f32 %v1083_v59, 0.0 }
 0x1d6   : > { %v1094_v0 = vpack.c.bf16 %v1090_v62, %v1088_v60  ;;  %v1095_v1 = vpack.c.bf16 %v1091_v63, %v1089_v61 }
 0x1d8   : > { %1241 = vmatmul.bf16.gmra.mxu0 %v1094_v0  ;;  %1260 = vmatmul.bf16.gmra.mxu1 %v1095_v1 }
 0x236   : > { %v1370_v49 = vpop.permute.xlu0 %1369 }
 0x237   : > { %v1372_v50 = vperm.slane %v1370_v49, 0 }
 0x245   : > { %v1237_v6 = vpop.f32.mrf.mxu0  ;;  %v1256_v7 = vpop.f32.mrf.mxu1 }
 0x246   : > { %v1238_v9 = vadd.f32 %v1788_v8, %v1237_v6 }
 0x248   : > { %v1257_v12 = vadd.f32 %v1256_v7, %v1238_v9 }
 0x24a   : > { %v1266_v15 = vmax.f32 %v1257_v12, 0.0 }
 0x24d   : > { %v1239_v10 = vpop.f32.mrf.mxu0  ;;  %v1258_v11 = vpop.f32.mrf.mxu1 }
 0x24e   : > { %v1240_v13 = vadd.f32 %v1788_v8, %v1239_v10 }
 0x250   : > { %v1259_v14 = vadd.f32 %v1258_v11, %v1240_v13 }
 0x252   : > { %v1267_v16 = vmax.f32 %v1259_v14, 0.0 }
 0x254   : > { %v1270_v17 = vpack.c.bf16 %v1267_v16, %v1266_v15 }
 0x255   : > { %v1242_v18 = vpop.f32.mrf.mxu0  ;;  %v1261_v19 = vpop.f32.mrf.mxu1 }
 0x256   : > { %1348 = vmatmul.bf16.vlgmr.msra.gmra.mxu3 %v1270_v17  ;;  %v1243_v20 = vadd.f32 %v1788_v8, %v1242_v18 }
 0x258   : > { %v1262_v22 = vadd.f32 %v1261_v19, %v1243_v20 }
 0x25a   : > { %v1268_v26 = vmax.f32 %v1262_v22, 0.0 }
 0x25d   : > { %v1244_v21 = vpop.f32.mrf.mxu0  ;;  %v1263_v24 = vpop.f32.mrf.mxu1 }
 0x25e   : > { %v1245_v23 = vadd.f32 %v1788_v8, %v1244_v21 }
 0x260   : > { %v1264_v25 = vadd.f32 %v1263_v24, %v1245_v23 }
 0x262   : > { %v1269_v27 = vmax.f32 %v1264_v25, 0.0 }
 0x264   : > { %v1271_v28 = vpack.c.bf16 %v1269_v27, %v1268_v26 }
 0x266   : > { %1353 = vmatmul.bf16.gmra.mxu3 %v1271_v28 }
 0x2d9   : > { %v1349_v29 = vpop.f32.mrf.mxu3 }
 0x2da   : > { %v1350_v41 = vadd.f32 %v1789_v34, %v1349_v29 }
 0x2dc   : > { %v1359_v45 = vmax.f32 %v1350_v41, 0.0 }
 0x2e1   : > { %v1351_v30 = vpop.f32.mrf.mxu3 }
 0x2e2   : > { %v1352_v38 = vadd.f32 %v1789_v34, %v1351_v30 }
 0x2e4   : > { %v1360_v43 = vmax.f32 %v1352_v38, 0.0 }
 0x2e6   : > { %v1364_v46 = vpack.c.bf16 %v1360_v43, %v1359_v45 }
 0x2e8   : > { %v1377_v47 = vsel %vm941_vm3, %v1364_v46, 0 }
 0x2e9   : > { %v1354_v32 = vpop.f32.mrf.mxu3 }
 0x2ea   : > { %v1355_v35 = vadd.f32 %v1789_v34, %v1354_v32 }
 0x2ec   : > { %v1361_v39 = vmax.f32 %v1355_v35, 0.0 }
 0x2f1   : > { %v1356_v36 = vpop.f32.mrf.mxu3 }
 0x2f2   : > { %v1357_v37 = vadd.f32 %v1789_v34, %v1356_v36 }
 0x2f4   : > { %v1362_v40 = vmax.f32 %v1357_v37, 0.0 }
 0x2f6   : > { %v1365_v42 = vpack.c.bf16 %v1362_v40, %v1361_v39 }
 0x2f8   : > { %v1380_v44 = vsel %vm941_vm3, %v1365_v42, 0 }
 0x2f9   : > { %1388 = vmatpush.bf16.xpose.msra.mxu2 %v1380_v44 }
 0x301   : > { %1389 = vmatpush.bf16.xpose.msra.mxu2 %v1377_v47 }
 0x308   : > { %1719 = vmatmul.msk.bf16.vlgmr.msra.gmra.mxu2 %vm941_vm3, %v1363_v48 }
 0x38b   : > { %v1391_v51 = vpop.f32.mrf.mxu2 }
 0x38c   : > { %v1392_v52 = vadd.f32 %v1391_v51, %v1372_v50 }
 0x38e   : > { %v1720_v53 = vmul.f32 -1.442695, %v1392_v52 }
 0x390   : > { %1790 = vpow2.f32 %v1720_v53 }
 0x393   : > { %v1393_v54 = vpop.f32.mrf.mxu2 }
 0x396   : > { %v1791_v55 = vpop.eup %1790 }
 0x397   : > { %v1398_v56 = vadd.f32 1.0, %v1791_v55 }
 0x399   : > { %1792 = vrcp.f32 %v1398_v56  ;;  %v1410_v60 = vand.u32 2147483648, %v1398_v56  ;;  %v1408_v62 = vand.u32 2147483647, %v1398_v56  ;;  %vm1404_vm5 = vweird.f32 %v1398_v56 }
 0x39b   : > { %v1411_v0 = vor.u32 1.1754944e-38, %v1410_v60  ;;  %vm1409_vm8 = vcmp.eq.f32.partialorder %v1408_v62, 8.507059e+37 }
 0x39f   : > { %v1793_v57 = vpop.eup %1792 }
 0x3a0   : > { %v1400_v58 = vmul.f32 %v1793_v57, %v1398_v56  ;;  %vm1405_vm4 = vweird.f32 %v1793_v57 }
 0x3a1   : > { %vm1406_vm6 = vmor %vm1404_vm5, %vm1405_vm4 }
 0x3a2   : > { %v1401_v59 = vsub.f32 1.0, %v1400_v58 }
 0x3a4   : > { %v1402_v61 = vmul.f32 %v1793_v57, %v1401_v59 }
 0x3a6   : > { %v1403_v63 = vadd.f32 %v1793_v57, %v1402_v61 }
 0x3a8   : > { %v1407_v1 = vsel %vm1406_vm6, %v1793_v57, %v1403_v63 }
 0x3a9   : > { %v1412_v2 = vsel %vm1409_vm8, %v1411_v0, %v1407_v1 }
 0x3aa   : > { %1415 = vst.msk [vmem:[%s641_s0] sm:$0x1] %vm1414_vm7, %v1412_v2 }
 0x3ab PF: > { %s31_s20 = sadd.s32 1, %s1800_s20  }
 0x3ac   : > { %p28_p5 = scmp.ge.s32.totalorder %s31_s20, 4  }
 0x3ae   :  { %30 = sbr.rel (!%p28_p5) target bundleno = 5 (0x5), region = 132 }

</bundles_post_ra>
